<compile_context>
chip_gen: v5e
topology: v5e:2x2
jax: 0.10.0
libtpu: 0.0.40
codegen_flags: <defaults>
</compile_context>

<pallas_src>
import jax
import jax.numpy as jnp
from jax.experimental import pallas as pl
from jax.experimental.pallas import tpu as pltpu

_MIB = 1024 * 1024


def _round_up(x, m):
    return (x + m - 1) // m * m


def _num_tensorcores():
    """Best-effort TensorCores-per-device query (defaults to 1)."""
    try:
        info = pltpu.get_tpu_info()
        for attr in ("num_cores", "num_tensorcores", "tensorcore_count",
                     "cores_per_chip"):
            v = getattr(info, attr, None)
            if v:
                return int(v)
    except Exception:
        pass
    try:
        v = getattr(jax.devices()[0], "num_cores", None)
        if v:
            return int(v)
    except Exception:
        pass
    return 1


# ----------------------------------------------------------------------------
# Fused single-pass kernel: whole (Cf, Sf) slab resident for one batch element.
# 1 read + 1 write of U (traffic optimal).
# ----------------------------------------------------------------------------
def _cse_fused_kernel(x_ref, w1_ref, w2_ref, o_ref):
    # Global average pool: lane-axis sum with f32 accumulation.  The 1/S factor
    # is pre-folded into w1 by the wrapper, so no runtime divide and no full
    # f32 copy of the slab.
    pooled = jnp.sum(x_ref[0], axis=-1, keepdims=True,
                     dtype=jnp.float32)                      # (Cf, 1) f32

    # Tiny gate matmuls; fully hidden under the neighbouring batch's slab DMA.
    # TODO(synk): could be made lane-dense ((1,C) @ W.T) but it is irrelevant
    # at these sizes.
    z1 = jnp.dot(w1_ref[...], pooled, preferred_element_type=jnp.float32)  # (C2, 1)
    z2 = jnp.dot(w2_ref[...], z1, preferred_element_type=jnp.float32)      # (Cf, 1)
    gate = jax.nn.sigmoid(z2)                                              # (Cf, 1) f32

    # Rescale in the I/O dtype (no full-block f32 temp; bf16-native on v6e/v7x).
    x = x_ref[0]
    o_ref[0] = (x * gate.astype(x.dtype)).astype(o_ref.dtype)


# ----------------------------------------------------------------------------
# Two-phase fallback, phase 1: per-(batch, S-tile) partial channel sums.
# Fully parallel grid; only the remainder tile pays the masking cost.
# ----------------------------------------------------------------------------
def _make_pool_kernel(ts, s_total):
    need_mask = (s_total % ts) != 0

    def kernel(x_ref, out_ref):
        def full_sum():
            return jnp.sum(x_ref[0], axis=-1, keepdims=True, dtype=jnp.float32)

        if not need_mask:
            out_ref[0, 0] = full_sum()
        else:
            si = pl.program_id(1)
            last = pl.num_programs(1) - 1

            @pl.when(si != last)
            def _full():
                out_ref[0, 0] = full_sum()

            @pl.when(si == last)
            def _masked():
                x = x_ref[0]
                lane = jax.lax.broadcasted_iota(jnp.int32, x.shape, 1)
                valid = lane < (s_total - si * ts)
                xz = jnp.where(valid, x, jnp.zeros_like(x))
                out_ref[0, 0] = jnp.sum(xz, axis=-1, keepdims=True,
                                        dtype=jnp.float32)

    return kernel


# ----------------------------------------------------------------------------
# Two-phase fallback, phase 2: pure per-channel rescale (gate computed in JAX).
# ----------------------------------------------------------------------------
def _cse_scale_kernel(g_ref, x_ref, o_ref):
    x = x_ref[0]                                          # (Cf, TS), I/O dtype
    gate = g_ref[0].astype(x.dtype)                       # (Cf, 1)
    o_ref[0] = (x * gate).astype(o_ref.dtype)


# ----------------------------------------------------------------------------
# Wrapper
# ----------------------------------------------------------------------------
def cse_forward(u, w_squeeze, w_excite, *, donate_input=False,
                force_two_phase=False, _force_ts=None):
    """u: (N, C, D, H, W).  w_squeeze: (C//2, C).  w_excite: (C, C//2)."""
    n, c, d, h, w = u.shape
    c2 = w_squeeze.shape[0]
    s = d * h * w
    dt = u.dtype
    itemsize = jnp.dtype(dt).itemsize
    sub_q = max(8, 32 // itemsize)            # sublane quantum: 8 f32 / 16 bf16

    # ---- small-C sublane folding: (N, C, S) -> (N, C*r, S/r) ----------------
    r = 1
    if c < sub_q:
        for cand in range(max(2, sub_q // c), 1, -1):
            if s % cand == 0:
                r = cand
                break
    c_f, s_f = c * r, s // r
    x = u.reshape(n, c, r, s_f).reshape(n, c_f, s_f)

    # Gate weights in f32; fold the 1/S of the average pool into w1 (free).
    w1 = w_squeeze.astype(jnp.float32) * jnp.float32(1.0 / s)      # (C2, C)
    w2 = w_excite.astype(jnp.float32)                              # (C, C2)
    # Fold absorbed into the weights so the fused kernel stays layout-agnostic.
    w1_f = jnp.repeat(w1, r, axis=1) if r > 1 else w1              # (C2, Cf)
    w2_f = jnp.repeat(w2, r, axis=0) if r > 1 else w2              # (Cf, C2)

    # ------------------------- VMEM budgeting -------------------------------
    c_pad = _round_up(c_f, sub_q)
    s_pad = _round_up(s_f, 128)
    try:
        vmem_cap = int(pltpu.get_tpu_info().vmem_capacity_bytes)
    except Exception:
        vmem_cap = 64 * _MIB                  # conservative (v7x per-TC)
    vmem_cap = min(vmem_cap, 128 * _MIB)
    usable = max(16 * _MIB, int(vmem_cap * 0.75) - 8 * _MIB)

    weight_bytes = 2 * 4 * (_round_up(c2, 8) * _round_up(c_f, 128)
                            + _round_up(c_f, 8) * _round_up(c2, 128))
    # in + out slab blocks, double-buffered, plus weights and fixed headroom.
    fused_need = 4 * c_pad * s_pad * itemsize + weight_bytes + 4 * _MIB

    num_cores = _num_tensorcores()
    use_fused = ((not force_two_phase)
                 and fused_need <= usable
                 and n >= num_cores)          # never idle a TensorCore

    if use_fused:
        # ---------------- single-pass, whole-slab resident ------------------
        vmem_limit = int(min(vmem_cap - 2 * _MIB, fused_need + 8 * _MIB))
        out = pl.pallas_call(
            _cse_fused_kernel,
            out_shape=jax.ShapeDtypeStruct((n, c_f, s_f), dt),
            grid_spec=pltpu.PrefetchScalarGridSpec(
                num_scalar_prefetch=0,
                grid=(n,),
                in_specs=[
                    pl.BlockSpec((1, c_f, s_f), lambda b: (b, 0, 0)),
                    pl.BlockSpec((c2, c_f), lambda b: (0, 0)),
                    pl.BlockSpec((c_f, c2), lambda b: (0, 0)),
                ],
                out_specs=pl.BlockSpec((1, c_f, s_f), lambda b: (b, 0, 0)),
            ),
            compiler_params=pltpu.CompilerParams(
                dimension_semantics=("parallel",),
                vmem_limit_bytes=vmem_limit),
            cost_estimate=pl.CostEstimate(
                flops=2 * n * c * s + 4 * n * c * c2,
                transcendentals=n * c,
                bytes_accessed=2 * n * c * s * itemsize + 2 * c * c2 * 4),
            input_output_aliases=({0: 0} if donate_input else {}),
        )(x, w1_f, w2_f)
        return out.reshape(n, c, d, h, w)

    # ------------------- two-phase S-tiled fallback --------------------------
    # Right-size the lane tile: HBM roofline saturates well below VMEM-filling
    # tiles; target ~2 MiB blocks for granularity + compiler-scratch headroom.
    lane_budget = (2 * _MIB) // (c_pad * itemsize)
    vmem_lane_cap = (usable - 8 * _MIB) // (4 * c_pad * itemsize)
    ts_cap = min(16384, lane_budget, max(vmem_lane_cap, 128))
    ts_cap = max(128, (ts_cap // 128) * 128)
    ts = _force_ts if _force_ts is not None else min(_round_up(s_f, 128), ts_cap)
    ns = pl.cdiv(s_f, ts)

    pool_limit = int(min(vmem_cap - 2 * _MIB,
                         2 * c_pad * ts * itemsize + 8 * _MIB))
    scale_limit = int(min(vmem_cap - 2 * _MIB,
                          4 * c_pad * ts * itemsize + 8 * _MIB))

    # Phase 1: partial channel sums, fully parallel over (batch, S-tile).
    partial = pl.pallas_call(
        _make_pool_kernel(ts, s_f),
        out_shape=jax.ShapeDtypeStruct((n, ns, c_f, 1), jnp.float32),
        grid_spec=pltpu.PrefetchScalarGridSpec(
            num_scalar_prefetch=0,
            grid=(n, ns),
            in_specs=[pl.BlockSpec((1, c_f, ts), lambda b, si: (b, 0, si))],
            out_specs=pl.BlockSpec((1, 1, c_f, 1), lambda b, si: (b, si, 0, 0)),
        ),
        compiler_params=pltpu.CompilerParams(
            dimension_semantics=("parallel", "parallel"),
            vmem_limit_bytes=pool_limit),
        cost_estimate=pl.CostEstimate(
            flops=n * c * s, transcendentals=0,
            bytes_accessed=n * c * s * itemsize + n * ns * c_f * 4),
    )(x)

    # Gate: finish the reduction + tiny matmuls + sigmoid in plain JAX
    # (hoisted off the streaming critical path).
    sums = jnp.sum(partial[..., 0], axis=1)                # (N, Cf) f32
    if r > 1:
        sums = sums.reshape(n, c, r).sum(axis=-1)           # (N, C)
    z = sums @ w1.T                                         # (N, C2); 1/S in w1
    z = z @ w2.T                                            # (N, C)
    gate = jax.nn.sigmoid(z)                                # (N, C)
    if r > 1:
        gate = jnp.repeat(gate, r, axis=1)                  # (N, Cf)
    gate = gate[:, :, None].astype(jnp.float32)             # (N, Cf, 1)

    # Phase 2: re-stream U tiles and rescale by the per-channel gate.
    out = pl.pallas_call(
        _cse_scale_kernel,
        out_shape=jax.ShapeDtypeStruct((n, c_f, s_f), dt),
        grid_spec=pltpu.PrefetchScalarGridSpec(
            num_scalar_prefetch=0,
            grid=(n, ns),
            in_specs=[
                pl.BlockSpec((1, c_f, 1), lambda b, si: (b, 0, 0)),
                pl.BlockSpec((1, c_f, ts), lambda b, si: (b, 0, si)),
            ],
            out_specs=pl.BlockSpec((1, c_f, ts), lambda b, si: (b, 0, si)),
        ),
        compiler_params=pltpu.CompilerParams(
            dimension_semantics=("parallel", "parallel"),
            vmem_limit_bytes=scale_limit),
        cost_estimate=pl.CostEstimate(
            flops=n * c * s, transcendentals=0,
            bytes_accessed=2 * n * c * s * itemsize + n * c_f * 4),
        input_output_aliases=({1: 0} if donate_input else {}),
    )(gate, x)

    return out.reshape(n, c, d, h, w)


# ----------------------------------------------------------------------------
# Pure-JAX reference
# ----------------------------------------------------------------------------
def cse_reference(u, w_squeeze, w_excite):
    z = jnp.mean(u.astype(jnp.float32), axis=(2, 3, 4))    # (N, C)
    z = z @ w_squeeze.astype(jnp.float32).T                # (N, C//2)
    z = z @ w_excite.astype(jnp.float32).T                 # (N, C)
    z = jax.nn.sigmoid(z)
    return u.astype(jnp.float32) * z[:, :, None, None, None]


if __name__ == "__main__":
    key = jax.random.PRNGKey(0)
    k_u, k_w1, k_w2, k_u2, k_w3, k_w4 = jax.random.split(key, 6)

    # --- test 1: small demo shape, fused path (C=4 -> sublane-folded), f32 --
    N, C, D, H, W = 2, 4, 8, 8, 8
    C2 = C // 2
    u = jax.random.normal(k_u, (N, C, D, H, W), dtype=jnp.float32)
    w_squeeze = 0.1 * jax.random.normal(k_w1, (C2, C), dtype=jnp.float32)
    w_excite = 0.1 * jax.random.normal(k_w2, (C, C2), dtype=jnp.float32)

    ref = cse_reference(u, w_squeeze, w_excite)
    out = jax.block_until_ready(cse_forward(u, w_squeeze, w_excite))
    assert out.shape == u.shape
    assert jnp.allclose(out, ref, atol=1e-5, rtol=1e-5), "fused path mismatch"

    # --- test 2: same inputs through the two-phase S-tiled fallback ---------
    out_tp = jax.block_until_ready(
        cse_forward(u, w_squeeze, w_excite, force_two_phase=True, _force_ts=128))
    assert jnp.allclose(out_tp, ref, atol=1e-5, rtol=1e-5), "two-phase mismatch"

    # --- test 3: ragged spatial size (masked remainder tile, no fold) -------
    N2, C2b, D2, H2, W2 = 1, 8, 5, 6, 7            # S = 210, not a 128 multiple
    u2 = jax.random.normal(k_u2, (N2, C2b, D2, H2, W2), dtype=jnp.float32)
    ws2 = 0.1 * jax.random.normal(k_w3, (C2b // 2, C2b), dtype=jnp.float32)
    we2 = 0.1 * jax.random.normal(k_w4, (C2b, C2b // 2), dtype=jnp.float32)
    ref2 = cse_reference(u2, ws2, we2)
    out2 = jax.block_until_ready(
        cse_forward(u2, ws2, we2, force_two_phase=True, _force_ts=128))
    assert jnp.allclose(out2, ref2, atol=1e-5, rtol=1e-5), "masked tile mismatch"

    # --- test 4: bf16 I/O (f32 pool accumulation, bf16-native rescale) ------
    u_bf = u.astype(jnp.bfloat16)
    ref_bf = cse_reference(u_bf.astype(jnp.float32), w_squeeze, w_excite)
    out_bf = jax.block_until_ready(cse_forward(u_bf, w_squeeze, w_excite))
    assert out_bf.dtype == jnp.bfloat16
    assert jnp.allclose(out_bf.astype(jnp.float32), ref_bf, atol=3e-2, rtol=3e-2), \
        "bf16 path mismatch"

    print("KERNEL_OK")
</pallas_src>

<mosaic_0001>
module attributes {stable_mosaic.version = 11 : i64} {
  func.func @_cse_fused_kernel(%arg0: i32, %arg1: memref<1x8x256xf32, #tpu.memory_space<vmem>>, %arg2: memref<2x8xf32, #tpu.memory_space<vmem>>, %arg3: memref<8x2xf32, #tpu.memory_space<vmem>>, %arg4: memref<1x8x256xf32, #tpu.memory_space<vmem>>) attributes {dimension_semantics = [#tpu.dimension_semantics<parallel>], iteration_bounds = array<i64: 2>, scalar_prefetch = 0 : i64, scratch_operands = 0 : i64, tpu.core_type = #tpu.core_type<tc>, window_params = [{transform_indices = @transform_0, window_bounds = array<i64: 1, 8, 256>}, {pipeline_mode = #tpu.pipeline_mode<synchronous>, transform_indices = @transform_1, window_bounds = array<i64: 2, 8>}, {pipeline_mode = #tpu.pipeline_mode<synchronous>, transform_indices = @transform_2, window_bounds = array<i64: 8, 2>}, {transform_indices = @transform_3, window_bounds = array<i64: 1, 8, 256>}]} {
    %c0 = arith.constant 0 : index
    %c0_0 = arith.constant 0 : index
    %c0_1 = arith.constant 0 : index
    %0 = vector.load %arg1[%c0, %c0_0, %c0_1] : memref<1x8x256xf32, #tpu.memory_space<vmem>>, vector<1x8x256xf32>
    %1 = vector.shape_cast %0 : vector<1x8x256xf32> to vector<8x256xf32>
    %cst = arith.constant dense<0.000000e+00> : vector<8xf32>
    %2 = vector.multi_reduction <add>, %1, %cst [1] : vector<8x256xf32> to vector<8xf32>
    %3 = vector.shape_cast %2 : vector<8xf32> to vector<8x1xf32>
    %c0_2 = arith.constant 0 : index
    %c0_3 = arith.constant 0 : index
    %4 = vector.load %arg2[%c0_2, %c0_3] : memref<2x8xf32, #tpu.memory_space<vmem>>, vector<2x8xf32>
    %cst_4 = arith.constant dense<0.000000e+00> : vector<2x1xf32>
    %5 = tpu.matmul %4, %3, %cst_4 {dimension_numbers = #tpu.dot_dimension_numbers<[1], [0], [0], [1], [0, 0, 1, 1], [], []>} : vector<2x8xf32>, vector<8x1xf32>, vector<2x1xf32> -> vector<2x1xf32>
    %c0_5 = arith.constant 0 : index
    %c0_6 = arith.constant 0 : index
    %6 = vector.load %arg3[%c0_5, %c0_6] : memref<8x2xf32, #tpu.memory_space<vmem>>, vector<8x2xf32>
    %cst_7 = arith.constant dense<0.000000e+00> : vector<8x1xf32>
    %7 = tpu.matmul %6, %5, %cst_7 {dimension_numbers = #tpu.dot_dimension_numbers<[1], [0], [0], [1], [0, 0, 1, 1], [], []>} : vector<8x2xf32>, vector<2x1xf32>, vector<8x1xf32> -> vector<8x1xf32>
    %8 = arith.negf %7 : vector<8x1xf32>
    %9 = math.exp %8 : vector<8x1xf32>
    %cst_8 = arith.constant 1.000000e+00 : f32
    %10 = vector.broadcast %cst_8 : f32 to vector<8x1xf32>
    %11 = arith.addf %10, %9 : vector<8x1xf32>
    %12 = arith.divf %10, %11 : vector<8x1xf32>
    %c0_9 = arith.constant 0 : index
    %c0_10 = arith.constant 0 : index
    %c0_11 = arith.constant 0 : index
    %13 = vector.load %arg1[%c0_9, %c0_10, %c0_11] : memref<1x8x256xf32, #tpu.memory_space<vmem>>, vector<1x8x256xf32>
    %14 = vector.shape_cast %13 : vector<1x8x256xf32> to vector<8x256xf32>
    %15 = vector.broadcast %12 : vector<8x1xf32> to vector<8x256xf32>
    %16 = arith.mulf %14, %15 : vector<8x256xf32>
    %c0_12 = arith.constant 0 : index
    %c0_13 = arith.constant 0 : index
    %c0_14 = arith.constant 0 : index
    %17 = vector.load %arg4[%c0_12, %c0_13, %c0_14] : memref<1x8x256xf32, #tpu.memory_space<vmem>>, vector<1x8x256xf32>
    %18 = vector.shape_cast %17 : vector<1x8x256xf32> to vector<8x256xf32>
    %19 = vector.shape_cast %16 : vector<8x256xf32> to vector<1x8x256xf32>
    tpu.vector_store %arg4[%c0_12, %c0_13, %c0_14], %19 {strides = array<i32>} : memref<1x8x256xf32, #tpu.memory_space<vmem>>, vector<1x8x256xf32>,
    return
  }
  func.func @transform_0(%arg0: i32) -> (i32, i32, i32) {
    %c0_i32 = arith.constant 0 : i32
    %c0_i32_0 = arith.constant 0 : i32
    %c0_i32_1 = arith.constant 0 : i32
    return %arg0, %c0_i32, %c0_i32_0 : i32, i32, i32
  }
  func.func @transform_1(%arg0: i32) -> (i32, i32) {
    %c0_i32 = arith.constant 0 : i32
    %c0_i32_0 = arith.constant 0 : i32
    %c0_i32_1 = arith.constant 0 : i32
    return %c0_i32, %c0_i32_0 : i32, i32
  }
  func.func @transform_2(%arg0: i32) -> (i32, i32) {
    %c0_i32 = arith.constant 0 : i32
    %c0_i32_0 = arith.constant 0 : i32
    %c0_i32_1 = arith.constant 0 : i32
    return %c0_i32, %c0_i32_0 : i32, i32
  }
  func.func @transform_3(%arg0: i32) -> (i32, i32, i32) {
    %c0_i32 = arith.constant 0 : i32
    %c0_i32_0 = arith.constant 0 : i32
    %c0_i32_1 = arith.constant 0 : i32
    return %arg0, %c0_i32, %c0_i32_0 : i32, i32, i32
  }
}

</mosaic_0001>

<bundles_post_ra>
// kernel: tpu_custom_call.1
= control target key start
LH: loop header
LB: loop body
LE: loop exit
PB: predicated region body
PF: predicated region fallthrough
CT: control target
= control target key end

     0   :  { %8 = vsyncpa [#allocation3], 0  ;;  %s691_s0 = inlined_call_operand.hbm [shape: f32[2,8,256], index: 0, kind: input, shape index: {}]   ;;  %s692_s1 = inlined_call_operand.vmem [shape: f32[2,8], index: 1, kind: input, shape index: {}]   ;;  %s693_s2 = inlined_call_operand.vmem [shape: f32[8,2], index: 2, kind: input, shape index: {}]   ;;  %s694_s3 = inlined_call_operand.hbm [shape: f32[2,8,256], index: 3, kind: output, shape index: {}]  }
   0x1   :  { %10 = vsyncpa [#allocation3 + $0x1], 0 }
   0x2   :  { %11 = vsyncpa [#allocation4], 0 }
   0x3   :  { %13 = vsyncpa [#allocation4 + $0x1], 0  ;;  %s554_s12 = smov 0   ;;  %s556_s13 = smov 0  }
   0x4   :  { %s558_s14 = smov 0   ;;  %s560_s15 = smov 0  }
   0x5 LB: > { %s575_s16 = sadd.s32 4294967295, %s531_s15   ;;  %s363_s17 = sadd.s32 4294967294, %s531_s15   ;;  %s531_s15 = sphi %s560_s15, %s704_s15   ;;  %s527_s14 = sphi %s558_s14, %s703_s14   ;;  %s523_s13 = sphi %s556_s13, %s702_s13   ;;  %s519_s12 = sphi %s554_s12, %s701_s12  }
   0x6   : > { %s579_s18 = sadd.s32 1, %s531_s15   ;;  %s26_s19 = sadd.s32 1, %s527_s14 }
   0x7   : > { %s23_s20 = ssub.s32 %s531_s15, %s579_s18  ;;  %p33_p0 = scmp.ne.s32.totalorder %s527_s14, %s523_s13 }
   0x8   : > { %p24_p1 = scmp.eq.s32.totalorder %s23_s20, 0  ;;  %p34_p2 = scmp.eq.s32.totalorder %s531_s15, 0 }
   0x9   : > { %p39_p3 = scmp.ne.s32.totalorder %s523_s13, %s519_s12  ;;  %p40_p4 = scmp.eq.s32.totalorder %s575_s16, 0 }
   0xa   : > { %s591_s21 = scalar_select %p24_p1, %s527_s14, %s26_s19  }
   0xb   : > { %p593_p5 = por %p34_p2, %p33_p0  ;;  %p597_p6 = por %p40_p4, %p39_p3 }
   0xc   : > { %p105_p7 = scmp.eq.s32.totalorder %s575_s16, 1  ;;  %p111_p8 = scmp.eq.s32.totalorder %s363_s17, 1 }
   0xd   : > { %p395_p10 = scmp.lt.s32.totalorder %s531_s15, 2  ;;  %s137_s26 = sand.u32 1, %s527_s14  }
   0xe   : > { %p604_p11 = por %p105_p7, %p33_p0  ;;  %p608_p12 = por %p111_p8, %p39_p3 }
   0xf   : > { %s381_s27 = sshll.u32 %s531_s15, 4  ;;  %s366_s28 = sshll.u32 %s137_s26, 4 }
  0x10   : > { %s146_s4 = scalar_lea.hbm %s691_s0, %s381_s27  ;;  %s141_s6 = scalar_lea.vmem [#allocation2], %s366_s28 }
  0x11   : > { %s148_s5 = sshll.u32 %s146_s4, 4  ;;  %s150_s7 = sshll.u32 %s141_s6, 4  ;;  %s149_s5 = int_to_ptr.hbm [resolvable:$true] %s148_s5  ;;  %s151_s7 = int_to_ptr.vmem [resolvable:$true] %s150_s7 }
  0x12   : > { %p619_p13 = pnand %p395_p10, %p593_p5  ;;  %p369_p0 = scmp.ge.s32.totalorder %s531_s15, 1 }
  0x13   : > { %p155_p1 = scmp.lt.s32.totalorder %s531_s15, 3  ;;  %s138_s9 = scalar_lea.sflag [#allocation3], %s137_s26 }
  0x14   : > { %s435_s10 = sshra.s32 %s149_s5, 4  ;;  %p439_p3 = pneg %p619_p13  ;;  %s436_s10 = int_to_ptr.hbm [resolvable:$true] %s435_s10 }
  0x15   : > { %s437_s11 = scalar_lea.hbm %s436_s10, 16  ;;  %s442_s20 = scalar_lea.hbm %s691_s0, 32 }
  0x16   : > { %p438_p2 = scmp.ne.s32.totalorder %s436_s10, %s437_s11  ;;  %p443_p5 = scmp.lt.s32.totalorder %s436_s10, %s691_s0 }
  0x17   : > { %p444_p8 = scmp.lt.s32.totalorder %s442_s20, %s437_s11 }
  0x18   : > { %p440_p4 = pnand %p439_p3, %p438_p2 }
  0x19   : > { %p445_p10 = por %p444_p8, %p443_p5 }
  0x1a   : > { %p441_p7 = pneg %p440_p4 }
  0x1c   : > { %p446_p9 = pnand %p445_p10, %p441_p7 }
  0x1e   : > { %449 = shalt.err (!%p446_p9)
}
  0x1f   : > { %390 = dma.hbm_to_vmem [thread:$0]  (!%p619_p13), %s149_s5, 256, %s151_s7, %s138_s9  }
  0x20   : > { %p156_p2 = pnand %p369_p0, %p155_p1 }
  0x21   : > { %s640_s26 = sand.u32 (!%p156_p2), 1, %s523_s13  }
  0x22   : > { %159 = sbr.rel (%p156_p2) target bundleno = 562 (0x232), region = 32  ;;  %s370_s28 = sshll.u32 (!%p156_p2), %s640_s26, 4 }
  0x23   : > { %s162_s29 = scalar_lea.sflag (!%p156_p2), [#allocation3], %s640_s26  ;;  %s165_s30 = scalar_lea.vmem (!%p156_p2), [#allocation2], %s370_s28 }
  0x27   : > { %510 = dma.done.wait (%p597_p6), %s162_s29, 256  }
  0x28   : > { %512 = vsyncadd (%p597_p6), %s162_s29, 4294967040  ;;  %v189_v0 = vld [vmem:[%s165_s30] sm:$0xff]  ;;  %v190_v1 = vld [vmem:[%s165_s30 + $0x8] sm:$0xff]  ;;  %vm195_vm0 = vcmask 64512   ;;  %vm224_vm1 = vcmask 1041408   ;;  %vm220_vm2 = vcmask 15360  }
  0x29   : > { %v191_v2 = vadd.f32 %v190_v1, %v189_v0  ;;  %v194_v3 = vld [vmem:[%s692_s1] sm:$0x3]  ;;  %v533_v7 = vmov 0   ;;  %s382_s23 = sshll.u32 %s575_s16, 4  ;;  %s188_s11 = scalar_lea.vmem [#allocation5], %s370_s28 }
  0x2a   : > { %v219_v5 = vld [vmem:[%s693_s2] sm:$0xff]  ;;  %430 = vset.pattern.permute.xlu0 %v533_v7  ;;  %s288_s10 = scalar_lea.hbm %s694_s3, %s382_s23  ;;  %s290_s17 = sshll.u32 %s188_s11, 4  ;;  %s291_s17 = int_to_ptr.vmem [resolvable:$true] %s290_s17 }
  0x2b   : > { %192 = vadd.xlane.f32.xlu0 %v191_v2  ;;  %s292_s19 = sshll.u32 %s288_s10, 4  ;;  %s277_s20 = scalar_lea.sflag [#allocation4], %s640_s26  ;;  %s293_s19 = int_to_ptr.hbm [resolvable:$true] %s292_s19 }
  0x2c   : > { %s479_s22 = sshra.s32 %s293_s19, 4  ;;  %s485_s28 = scalar_lea.hbm %s694_s3, 32  ;;  %s480_s22 = int_to_ptr.hbm [resolvable:$true] %s479_s22 }
  0x2d   : > { %s481_s16 = scalar_lea.hbm %s480_s22, 16  ;;  %p486_p0 = scmp.lt.s32.totalorder %s480_s22, %s694_s3 }
  0x2e   : > { %p482_p6 = scmp.ne.s32.totalorder %s480_s22, %s481_s16  ;;  %p487_p1 = scmp.lt.s32.totalorder %s485_s28, %s481_s16 }
  0x30   : > { %p483_p9 = pnand %p482_p6, %p604_p11  ;;  %p488_p3 = por %p487_p1, %p486_p0 }
  0x32   : > { %p484_p13 = pneg %p483_p9 }
  0x34   : > { %p489_p4 = pnand %p488_p3, %p484_p13 }
  0x9e   : > { %v193_v4 = vpop.xlane.xlu0 %192 }
  0x9f   : > { %214 = vmatpush.msra.mxu0 %v193_v4 }
  0xa0   : > { %372 = vmatmul.msk.f32.vlgmr.msra.gmra.mxu0 %vm195_vm0, %v194_v3 }
 0x11d   : > { %v216_v6 = vpop.f32.mrf.mxu0 }
 0x11e   : > { %373 = vmatpush.msk.msra.mxu1 %vm224_vm1, %v216_v6 }
 0x11f   : > { %374 = vmatmul.msk.f32.vlgmr.msra.gmra.mxu1 %vm220_vm2, %v219_v5 }
 0x19c   : > { %v245_v8 = vpop.f32.mrf.mxu1 }
 0x19d   : > { %v375_v9 = vmul.f32 -1.442695, %v245_v8 }
 0x19f   : > { %431 = vpow2.f32 %v375_v9 }
 0x1a5   : > { %v432_v10 = vpop.eup %431 }
 0x1a6   : > { %v251_v11 = vadd.f32 1.0, %v432_v10 }
 0x1a8   : > { %433 = vrcp.f32 %v251_v11  ;;  %v263_v15 = vand.u32 2147483648, %v251_v11  ;;  %v261_v17 = vand.u32 2147483647, %v251_v11  ;;  %vm257_vm4 = vweird.f32 %v251_v11 }
 0x1aa   : > { %v264_v19 = vor.u32 1.1754944e-38, %v263_v15  ;;  %vm262_vm6 = vcmp.eq.f32.partialorder %v261_v17, 8.507059e+37 }
 0x1ae   : > { %v434_v12 = vpop.eup %433 }
 0x1af   : > { %v253_v13 = vmul.f32 %v434_v12, %v251_v11  ;;  %vm258_vm3 = vweird.f32 %v434_v12 }
 0x1b0   : > { %vm259_vm5 = vmor %vm257_vm4, %vm258_vm3 }
 0x1b1   : > { %v254_v14 = vsub.f32 1.0, %v253_v13 }
 0x1b3   : > { %v255_v16 = vmul.f32 %v434_v12, %v254_v14 }
 0x1b5   : > { %v256_v18 = vadd.f32 %v434_v12, %v255_v16 }
 0x1b7   : > { %v260_v20 = vsel %vm259_vm5, %v434_v12, %v256_v18 }
 0x1b8   : > { %v265_v21 = vsel %vm262_vm6, %v264_v19, %v260_v20 }
 0x1b9   : > { %269 = vperm.xlu0 %430, %v265_v21  }
 0x22b   : > { %v270_v22 = vpop.permute.xlu0 %269 }
 0x22c   : > { %v272_v23 = vmul.f32 %v270_v22, %v189_v0  ;;  %v273_v24 = vmul.f32 %v270_v22, %v190_v1 }
 0x22e   : > { %274 = vst [vmem:[%s188_s11] sm:$0xff] %v272_v23 }
 0x22f   : > { %275 = vst [vmem:[%s188_s11 + $0x8] sm:$0xff] %v273_v24 }
 0x230   : > { %492 = shalt.err (!%p489_p4)
}
 0x231   : > { %385 = dma.vmem_to_hbm [thread:$0]  (%p604_p11), %s291_s17, 256, %s293_s19, %s277_s20  }
 0x232 PF: > { %s304_s26 = sand.u32 1, %s519_s12   ;;  %p700_p7 = scmp.ge.s32.totalorder %s531_s15, 2 }
 0x233   : > { %s305_s5 = scalar_lea.sflag [#allocation4], %s304_s26 }
 0x234   : > { %p392_p5 = pnand %p700_p7, %p608_p12 }
 0x236   : > { %p393_p8 = pneg %p392_p5 }
 0x238   : > { %514 = dma.done.wait (%p393_p8), %s305_s5, 256  }
 0x239   : > { %516 = vsyncadd (%p393_p8), %s305_s5, 4294967040  ;;  %p16_p10 = scmp.ge.s32.totalorder %s579_s18, 4   ;;  %s701_s12 = smov %s523_s13 }
 0x23a   : > { %s702_s13 = smov %s527_s14  ;;  %s703_s14 = smov %s591_s21 }
 0x23b   : > { %s704_s15 = smov %s579_s18  ;;  %18 = sbr.rel (!%p16_p10) target bundleno = 5 (0x5), region = 77 }
 0x240   :  { %311 = vsyncpa [#allocation3], 1 }
 0x241   :  { %313 = vsyncpa [#allocation3 + $0x1], 1 }
 0x242   :  { %314 = vsyncpa [#allocation4], 1 }
 0x243   :  { %316 = vsyncpa [#allocation4 + $0x1], 1 }

</bundles_post_ra>
